<compile_context>
chip_gen: v6e
topology: v6e:2x2x1
jax: 0.10.0
libtpu: 0.0.40
codegen_flags: <defaults>
</compile_context>

<pallas_src>
import jax
import jax.numpy as jnp
from jax.experimental import pallas as pl
from jax.experimental.pallas import tpu as pltpu


def _dpb_kernel(b_ref, out_ref):
    # b_ref:   (1, bl)  — bias values, lane-dense.
    # out_ref: (H, bl)  — out[h, l] = biases[l] * (h + 1), lane-dense stores.
    head = (jax.lax.broadcasted_iota(jnp.int32, out_ref.shape, 0) + 1).astype(
        b_ref.dtype
    )
    out_ref[...] = head * b_ref[...]  # (H,bl) * (1,bl) broadcast on the VPU


def _pick_block_l(L: int, block_l: int) -> int:
    """Full-extent block if L is small / not lane-aligned, else the largest
    multiple of 128 <= block_l that divides L."""
    if L % 128 != 0 or L <= block_l:
        return L
    bl = max(128, (block_l // 128) * 128)
    while L % bl != 0:
        bl -= 128
    return bl


def simple_dynamic_pos_bias(
    biases: jax.Array, num_heads: int, *, block_l: int = 1024
) -> jax.Array:
    """Pallas implementation of SimpleDynamicPosBias.forward.

    biases: (L, 1) or (L,) float array of per-relative-position biases.
    returns: (L, num_heads), identical to `biases * arange(1, H+1)[None, :]`.
    """
    L = biases.shape[0]
    b_row = biases.reshape(1, L)  # lane-dense: L on the 128-lane axis

    bl = _pick_block_l(L, block_l)
    grid = (L // bl,)

    out_t = pl.pallas_call(
        _dpb_kernel,
        out_shape=jax.ShapeDtypeStruct((num_heads, L), biases.dtype),
        grid=grid,
        in_specs=[pl.BlockSpec((1, bl), lambda i: (0, i))],
        out_specs=pl.BlockSpec((num_heads, bl), lambda i: (0, i)),
        compiler_params=pltpu.CompilerParams(
            dimension_semantics=("parallel",),
        ),
    )(b_row)

    # Module semantics return (L, num_heads); consumers that want the
    # head-major (H, N, N) layout could take `out_t` directly instead.
    return out_t.T


if __name__ == "__main__":
    key = jax.random.PRNGKey(0)
    num_heads = 8
    L = 16  # number of relative-position entries (small demo size)

    biases = jax.random.normal(key, (L, 1), dtype=jnp.float32)

    out = simple_dynamic_pos_bias(biases, num_heads)
    out = jax.block_until_ready(out)

    # Reference check (pure JAX, same math as the PyTorch module).
    index_ref = jnp.arange(1, num_heads + 1, dtype=jnp.float32).reshape(1, num_heads)
    ref = biases * index_ref
    assert out.shape == (L, num_heads)
    assert jnp.allclose(out, ref, atol=0, rtol=0), "mismatch vs reference (small L)"

    # Also exercise the tiled (gridded) lane-aligned path with a larger L.
    L2 = 512
    biases2 = jax.random.normal(jax.random.PRNGKey(1), (L2, 1), dtype=jnp.float32)
    out2 = jax.block_until_ready(
        simple_dynamic_pos_bias(biases2, num_heads, block_l=128)
    )
    ref2 = biases2 * index_ref
    assert out2.shape == (L2, num_heads)
    assert jnp.allclose(out2, ref2, atol=0, rtol=0), "mismatch vs reference (tiled L)"

    print("KERNEL_OK")
</pallas_src>

<mosaic_0001>
module attributes {stable_mosaic.version = 11 : i64} {
  func.func @_dpb_kernel(%arg0: i32, %arg1: memref<1x16xf32, #tpu.memory_space<vmem>>, %arg2: memref<8x16xf32, #tpu.memory_space<vmem>>) attributes {dimension_semantics = [#tpu.dimension_semantics<parallel>], iteration_bounds = array<i64: 1>, scalar_prefetch = 0 : i64, scratch_operands = 0 : i64, tpu.core_type = #tpu.core_type<tc>, window_params = [{transform_indices = @transform_0, window_bounds = array<i64: 1, 16>}, {transform_indices = @transform_1, window_bounds = array<i64: 8, 16>}]} {
    %0 = tpu.iota {dimensions = array<i32: 0>} : vector<8x16xi32>
    %c1_i32 = arith.constant 1 : i32
    %1 = vector.broadcast %c1_i32 : i32 to vector<8x16xi32>
    %2 = arith.addi %0, %1 : vector<8x16xi32>
    %3 = arith.sitofp %2 : vector<8x16xi32> to vector<8x16xf32>
    %c0 = arith.constant 0 : index
    %c0_0 = arith.constant 0 : index
    %4 = vector.load %arg1[%c0, %c0_0] : memref<1x16xf32, #tpu.memory_space<vmem>>, vector<1x16xf32>
    %5 = vector.broadcast %4 : vector<1x16xf32> to vector<8x16xf32>
    %6 = arith.mulf %3, %5 : vector<8x16xf32>
    %c0_1 = arith.constant 0 : index
    %c0_2 = arith.constant 0 : index
    %7 = vector.load %arg2[%c0_1, %c0_2] : memref<8x16xf32, #tpu.memory_space<vmem>>, vector<8x16xf32>
    tpu.vector_store %arg2[%c0_1, %c0_2], %6 {strides = array<i32>} : memref<8x16xf32, #tpu.memory_space<vmem>>, vector<8x16xf32>,
    return
  }
  func.func @transform_0(%arg0: i32) -> (i32, i32) {
    %c0_i32 = arith.constant 0 : i32
    %c0_i32_0 = arith.constant 0 : i32
    return %c0_i32, %arg0 : i32, i32
  }
  func.func @transform_1(%arg0: i32) -> (i32, i32) {
    %c0_i32 = arith.constant 0 : i32
    %c0_i32_0 = arith.constant 0 : i32
    return %c0_i32, %arg0 : i32, i32
  }
}

</mosaic_0001>

<bundles_post_ra>
// kernel: tpu_custom_call.1
= control target key start
LH: loop header
LB: loop body
LE: loop exit
PB: predicated region body
PF: predicated region fallthrough
CT: control target
= control target key end

     0   :  { %6 = vsyncpa [#allocation3], 0  ;;  %s115_s0 = inlined_call_operand.hbm [shape: f32[1,16], index: 0, kind: input, shape index: {}]   ;;  %s116_s1 = inlined_call_operand.hbm [shape: f32[8,16], index: 1, kind: output, shape index: {}]  }
   0x1   :  { %7 = vsyncpa [#allocation4], 0  ;;  %s97_s6 = smov [#allocation2]  }
   0x2   :  { %s14_s7 = sshll.u32 %s97_s6, 4  ;;  %s15_s7 = int_to_ptr.vmem [resolvable:$true] %s14_s7 }
   0x3   :  { %s61_s8 = scalar_lea.vmem %s15_s7, 16  ;;  %s65_s9 = scalar_lea.vmem %s15_s7, 32 }
   0x4   :  { %p62_p0 = scmp.ne.s32.totalorder %s15_s7, %s61_s8  ;;  %p66_p1 = scmp.lt.s32.totalorder %s15_s7, %s15_s7 }
   0x5   :  { %p67_p2 = scmp.lt.s32.totalorder %s65_s9, %s61_s8 }
   0x7   :  { %p68_p3 = por %p67_p2, %p66_p1 }
   0x9   :  { %p69_p4 = pnand %p68_p3, %p62_p0 }
   0xb   :  { %72 = shalt.err (!%p69_p4)
}
   0xc   :  { %17 = dma.hbm_to_vmem [thread:$0]  %s115_s0, 16, %s15_s7, [#allocation3]  }
   0xd   :  { %93 = dma.done.wait [#allocation3], 16  }
   0xe   :  { %94 = vsyncadd [#allocation3], 4294967280  ;;  %v21_v0 = vlaneseq  ;;  %s98_s12 = smov [#allocation5]   ;;  %v50_v4 = vld [vmem:[#allocation2] ss:$0 sm:$0xff]  ;;  %vm33_vm0 = vcmask 130048  }
   0xf   :  { %s41_s13 = sshll.u32 %s98_s12, 4  ;;  %s42_s13 = int_to_ptr.vmem [resolvable:$true] %s41_s13 }
  0x10   :  { %v22_v1 = vshrl.u32 %v21_v0, 7  ;;  %s73_s14 = scalar_lea.vmem %s42_s13, 128  ;;  %p78_p6 = scmp.lt.s32.totalorder %s42_s13, %s42_s13 }
  0x11   :  { %p74_p5 = scmp.ne.s32.totalorder %s42_s13, %s73_s14  ;;  %p79_p7 = scmp.lt.s32.totalorder %s73_s14, %s73_s14 }
  0x12   :  { %v23_v2 = vadd.s32 1, %v22_v1 }
  0x13   :  { %p80_p8 = por %p79_p7, %p78_p6 }
  0x14   :  { %v24_v3 = vcvt.s32.f32 %v23_v2 }
  0x15   :  { %p81_p9 = pnand %p80_p8, %p74_p5 }
  0x16   :  { %v32_v5 = vmul.f32 %v50_v4, %v24_v3 }
  0x18   :  { %34 = vst.msk [vmem:[#allocation5] sm:$0xff] %vm33_vm0, %v32_v5 }
  0x19   :  { %84 = shalt.err (!%p81_p9)
}
  0x1a   :  { %44 = dma.vmem_to_hbm [thread:$0]  %s42_s13, 128, %s116_s1, [#allocation4]  }
  0x1b   :  { %95 = dma.done.wait [#allocation4], 128  }
  0x1c   :  { %96 = vsyncadd [#allocation4], 4294967168 }
  0x1d   :  { %48 = vsyncpa [#allocation3], 1 }
  0x1e   :  { %49 = vsyncpa [#allocation4], 1 }

</bundles_post_ra>
